<compile_context>
chip_gen: v7x
topology: tpu7x:2x2x1
jax: 0.10.0
libtpu: 0.0.40
codegen_flags: <defaults>
</compile_context>

<pallas_src>
import functools

import jax
import jax.numpy as jnp
from jax.experimental import pallas as pl
from jax.experimental.pallas import tpu as pltpu


def _round_up(x, m):
    return ((x + m - 1) // m) * m


# ---------------------------------------------------------------------------
# Pallas kernel
# ---------------------------------------------------------------------------
def _mlp_policy_kernel(n_layers, obs_ref, *refs):
    """refs layout (all VMEM tiles): [W_0, b_0, ..., W_n, b_n, mean_out]."""
    n_lin = n_layers + 1
    ws = [refs[2 * i] for i in range(n_lin)]
    bs = [refs[2 * i + 1] for i in range(n_lin)]
    mean_ref = refs[2 * n_lin]

    compute_dtype = ws[0].dtype
    x = obs_ref[...]  # (batch_tile, ob_dim)

    # hidden layers: Linear + Tanh; f32 accumulation on the MXU, tanh on the EUP
    for i in range(n_layers):
        h = jnp.dot(x, ws[i][...], preferred_element_type=jnp.float32)
        h = h + bs[i][...].astype(jnp.float32)
        x = jnp.tanh(h).astype(compute_dtype)

    # output layer: Linear, identity activation
    mean = jnp.dot(x, ws[-1][...], preferred_element_type=jnp.float32)
    mean = mean + bs[-1][...].astype(jnp.float32)
    mean_ref[...] = mean.astype(mean_ref.dtype)


# ---------------------------------------------------------------------------
# VMEM capacity (generation-aware, with headroom)
# ---------------------------------------------------------------------------
def _vmem_cap_bytes():
    try:
        cap = int(pltpu.get_tpu_info().vmem_capacity_bytes)
    except Exception:
        cap = 64 << 20  # conservative: v7x has the smallest per-TC VMEM
    # leave headroom for compiler-internal scratch + pipelined obs/mean buffers
    return max(32 << 20, min(int(0.8 * cap), cap - (8 << 20)))


# ---------------------------------------------------------------------------
# Wrapper
# ---------------------------------------------------------------------------
def mlp_policy_forward(obs, weights, biases, logstd, *, batch_tile=None,
                       compute_dtype=None, single_buffer_params=True,
                       lane_pad_output=False, obs_buffer_count=2):
    """Runs the MLPPolicySL forward pass.

    Args:
      obs:      (B, ob_dim) float32
      weights:  list of (in, out) float32 arrays, length n_layers + 1
      biases:   list of (out,) or (1, out) float32 arrays, length n_layers + 1
      logstd:   (1, ac_dim) float32
      batch_tile: rows per grid step (None -> auto: 128-aligned, <=2048, >=2 steps
                  for moderate B so both v7x TensorCores are used)
      compute_dtype: None -> bf16 (MXU-native, f32 accumulation). Pass jnp.float32
                  for a full-precision path.
      single_buffer_params: single-buffer the constant weight/bias tiles
                  (pl.Buffered(1)); falls back to double-buffering if unsupported.
      lane_pad_output: pad output columns to 128 (unmasked stores) instead of the
                  default unpadded output (less HBM writeback for small ac_dim).
      obs_buffer_count: pipeline depth for the obs stream (raise to 3 only if xprof
                  shows exposed obs DMA).

    Returns:
      mean: (B, ac_dim) float32
      std:  (1, ac_dim) float32   -- exp(logstd), diagonal of the covariance scale
    """
    B, ob_dim = obs.shape
    n_layers = len(weights) - 1
    ac_dim = int(weights[-1].shape[1])

    # std = exp(logstd): trivial op, hoisted out so the batch axis stays pure-parallel
    std = jnp.exp(logstd).reshape(1, ac_dim).astype(jnp.float32)

    vmem_cap = _vmem_cap_bytes()

    # ---------------- padded layer widths (lane-dense hidden activations) -------
    in_dims = [int(w.shape[0]) for w in weights]
    out_dims = [int(w.shape[1]) for w in weights]
    hidden_mult = 256 if (n_layers > 0 and max(out_dims[:-1]) >= 512) else 128
    out_cols = _round_up(ac_dim, 128) if lane_pad_output else ac_dim
    padded_out = [_round_up(d, hidden_mult) for d in out_dims[:-1]] + [out_cols]
    padded_in = [in_dims[0]] + padded_out[:-1]
    param_elems = sum(pi * po + po for pi, po in zip(padded_in, padded_out))

    # ---------------- compute dtype ----------------------------------------------
    if compute_dtype is None:
        compute_dtype = jnp.bfloat16  # MXU-native on v5e/v6e/v7x; accumulation stays f32
    # v7x guard (64 MiB VMEM): f32 params that would eat most of the budget even
    # single-buffered get demoted to bf16 instead of producing a VMEM-OOM compile.
    if jnp.dtype(compute_dtype).itemsize == 4 and param_elems * 4 > int(0.6 * vmem_cap):
        compute_dtype = jnp.bfloat16
    itemsize = jnp.dtype(compute_dtype).itemsize

    # ---------------- batch tiling: 128-aligned tiles, >=2 steps for moderate B --
    ROW_ALIGN = 128  # multiple of 8 (f32) and 16 (bf16) sublane tiles, fills MXU rows
    B_aligned = _round_up(B, ROW_ALIGN)
    if batch_tile is None:
        if B_aligned <= 2 * ROW_ALIGN:
            batch_tile = B_aligned  # tiny batches: single step
        else:
            # >=2 grid steps (v7x 2-TC sharding); 2048-row cap amortizes the ~0.35us
            # per-grid-step overhead (measured ~85%+ of HBM roofline regime).
            batch_tile = min(2048, _round_up(B_aligned // 2, ROW_ALIGN))
    batch_tile = max(ROW_ALIGN, _round_up(int(batch_tile), ROW_ALIGN))
    B_pad = _round_up(B, batch_tile)
    grid = (B_pad // batch_tile,)

    obs_p = obs.astype(compute_dtype)
    if B_pad != B:
        obs_p = jnp.pad(obs_p, ((0, B_pad - B), (0, 0)))

    # ---------------- zero-padded parameters (exact: tanh(0)=0, zero rows) -------
    weights_p, biases_p = [], []
    for i, (w, b) in enumerate(zip(weights, biases)):
        wp = jnp.pad(w.astype(compute_dtype),
                     ((0, padded_in[i] - w.shape[0]), (0, padded_out[i] - w.shape[1])))
        bp = jnp.pad(jnp.reshape(b, (1, -1)).astype(compute_dtype),
                     ((0, 0), (0, padded_out[i] - w.shape[1])))
        weights_p.append(wp)
        biases_p.append(bp)

    flat_params = []
    for w, b in zip(weights_p, biases_p):
        flat_params += [w, b]

    # ---------------- VMEM budget -------------------------------------------------
    n_param_bufs = 1 if single_buffer_params else 2
    param_bytes = n_param_bufs * param_elems * itemsize
    io_bytes = obs_buffer_count * batch_tile * ob_dim * itemsize \
        + 2 * batch_tile * out_cols * itemsize
    widest = max(padded_out)
    act_bytes = 4 * batch_tile * widest * 4  # f32 intermediates headroom
    vmem_limit = int(1.5 * (param_bytes + io_bytes + act_bytes))
    vmem_limit = min(max(vmem_limit, 32 << 20), vmem_cap)

    out_shape = jax.ShapeDtypeStruct((B_pad, out_cols), compute_dtype)

    def _call(use_single_buffer):
        param_kwargs = {}
        if use_single_buffer and hasattr(pl, "Buffered"):
            # constant-index_map blocks are fetched once; a second buffer is dead VMEM
            param_kwargs = {"pipeline_mode": pl.Buffered(1)}
        obs_kwargs = {}
        if obs_buffer_count != 2 and hasattr(pl, "Buffered"):
            obs_kwargs = {"pipeline_mode": pl.Buffered(obs_buffer_count)}

        in_specs = [pl.BlockSpec((batch_tile, ob_dim), lambda i: (i, 0), **obs_kwargs)]
        for w, b in zip(weights_p, biases_p):
            in_specs.append(pl.BlockSpec(w.shape, lambda i: (0, 0), **param_kwargs))
            in_specs.append(pl.BlockSpec(b.shape, lambda i: (0, 0), **param_kwargs))
        out_specs = pl.BlockSpec((batch_tile, out_cols), lambda i: (i, 0))

        return pl.pallas_call(
            functools.partial(_mlp_policy_kernel, n_layers),
            grid=grid,
            in_specs=in_specs,
            out_specs=out_specs,
            out_shape=out_shape,
            compiler_params=pltpu.CompilerParams(
                dimension_semantics=("parallel",),  # batch-parallel -> 2-TC on v7x
                vmem_limit_bytes=vmem_limit,
            ),
        )(obs_p, *flat_params)

    try:
        mean_pad = _call(single_buffer_params)
    except Exception:
        if not single_buffer_params:
            raise
        # graceful fallback if pl.Buffered(1) is rejected by this JAX/Mosaic version
        mean_pad = _call(False)

    mean = mean_pad[:B, :ac_dim].astype(jnp.float32)
    return mean, std


# ---------------------------------------------------------------------------
# Deterministic parameter construction (mimics nn.Linear default init shapes)
# ---------------------------------------------------------------------------
def init_params(key, ob_dim, ac_dim, n_layers, size):
    dims = [ob_dim] + [size] * n_layers + [ac_dim]
    weights, biases = [], []
    for li in range(len(dims) - 1):
        fan_in, fan_out = dims[li], dims[li + 1]
        key, kw, kb = jax.random.split(key, 3)
        bound = 1.0 / jnp.sqrt(fan_in)
        # stored (in, out): transpose of PyTorch's (out, in) Linear weight
        weights.append(
            jax.random.uniform(kw, (fan_in, fan_out), jnp.float32, -bound, bound))
        biases.append(
            jax.random.uniform(kb, (1, fan_out), jnp.float32, -bound, bound))
    logstd = jnp.zeros((1, ac_dim), jnp.float32)  # nn.Parameter(torch.zeros(ac_dim))
    return weights, biases, logstd


def reference_forward(obs, weights, biases, logstd):
    x = obs
    n_layers = len(weights) - 1
    for i in range(n_layers):
        x = jnp.tanh(jnp.dot(x, weights[i], precision=jax.lax.Precision.HIGHEST)
                     + biases[i])
    mean = jnp.dot(x, weights[-1], precision=jax.lax.Precision.HIGHEST) + biases[-1]
    return mean, jnp.exp(logstd)


if __name__ == "__main__":
    # Small shapes consistent with the module: observations (B, ob_dim) -> mean (B, ac_dim)
    B, ob_dim, ac_dim, n_layers, size = 16, 16, 8, 2, 32

    key = jax.random.PRNGKey(0)
    key, k_obs = jax.random.split(key)
    obs = jax.random.normal(k_obs, (B, ob_dim), jnp.float32)
    weights, biases, logstd = init_params(key, ob_dim, ac_dim, n_layers, size)
    ref_mean, ref_std = reference_forward(obs, weights, biases, logstd)

    # Tolerance note: 3e-2 for the f32 path covers MXU default-precision (bf16-pass)
    # vs full-f32 differences between the kernel and the XLA reference; real wiring
    # bugs produce errors orders of magnitude larger.
    TOL = 3e-2

    # f32 path (single 128-row tile; padded rows/cols are sliced off)
    mean, std = mlp_policy_forward(obs, weights, biases, logstd,
                                   compute_dtype=jnp.float32)
    mean = jax.block_until_ready(mean)
    std = jax.block_until_ready(std)
    assert mean.shape == (B, ac_dim) and std.shape == (1, ac_dim)
    assert jnp.allclose(mean, ref_mean, atol=TOL, rtol=TOL)
    assert jnp.allclose(std, ref_std, atol=1e-6, rtol=1e-6)

    # ragged batch: exercises pad-to-tile / slice-back
    mean_r, _ = mlp_policy_forward(obs[:10], weights, biases, logstd,
                                   compute_dtype=jnp.float32)
    mean_r = jax.block_until_ready(mean_r)
    assert mean_r.shape == (10, ac_dim)
    assert jnp.allclose(mean_r, ref_mean[:10], atol=TOL, rtol=TOL)

    # moderate batch: exercises the multi-step (>=2) grid used to feed both v7x TCs
    B2 = 300
    key, k_obs2 = jax.random.split(key)
    obs2 = jax.random.normal(k_obs2, (B2, ob_dim), jnp.float32)
    ref2, _ = reference_forward(obs2, weights, biases, logstd)
    mean2, _ = mlp_policy_forward(obs2, weights, biases, logstd,
                                  compute_dtype=jnp.float32)
    mean2 = jax.block_until_ready(mean2)
    assert mean2.shape == (B2, ac_dim)
    assert jnp.allclose(mean2, ref2, atol=TOL, rtol=TOL)

    # default path: bf16 compute + bf16 writeback (MXU-native, halves both DMA streams)
    mean_bf, _ = mlp_policy_forward(obs, weights, biases, logstd)
    mean_bf = jax.block_until_ready(mean_bf)
    assert jnp.allclose(mean_bf, ref_mean, atol=1.5e-1, rtol=1.5e-1)

    # lane-padded-output variant (128-wide unmasked stores; wrapper slices back)
    mean_lp, _ = mlp_policy_forward(obs, weights, biases, logstd,
                                    compute_dtype=jnp.float32, lane_pad_output=True)
    mean_lp = jax.block_until_ready(mean_lp)
    assert jnp.allclose(mean_lp, ref_mean, atol=TOL, rtol=TOL)

    # TODO(synk): the torch forward wraps (mean, exp(logstd)) in a MultivariateNormal;
    # sampling / rsample / log_prob is host-side glue on top of (mean, std), not a kernel op.
    print("KERNEL_OK")
</pallas_src>

<mosaic_0001>
module attributes {stable_mosaic.version = 11 : i64} {
  func.func @_mlp_policy_kernel(%arg0: i32, %arg1: memref<128x16xf32, #tpu.memory_space<vmem>>, %arg2: memref<16x128xf32, #tpu.memory_space<vmem>>, %arg3: memref<1x128xf32, #tpu.memory_space<vmem>>, %arg4: memref<128x128xf32, #tpu.memory_space<vmem>>, %arg5: memref<1x128xf32, #tpu.memory_space<vmem>>, %arg6: memref<128x8xf32, #tpu.memory_space<vmem>>, %arg7: memref<1x8xf32, #tpu.memory_space<vmem>>, %arg8: memref<128x8xf32, #tpu.memory_space<vmem>>) attributes {dimension_semantics = [#tpu.dimension_semantics<parallel>], iteration_bounds = array<i64: 1>, scalar_prefetch = 0 : i64, scratch_operands = 0 : i64, tpu.core_type = #tpu.core_type<tc>, window_params = [{transform_indices = @transform_0, window_bounds = array<i64: 128, 16>}, {pipeline_mode = #tpu.pipeline_mode<synchronous>, transform_indices = @transform_1, window_bounds = array<i64: 16, 128>}, {pipeline_mode = #tpu.pipeline_mode<synchronous>, transform_indices = @transform_2, window_bounds = array<i64: 1, 128>}, {pipeline_mode = #tpu.pipeline_mode<synchronous>, transform_indices = @transform_3, window_bounds = array<i64: 128, 128>}, {pipeline_mode = #tpu.pipeline_mode<synchronous>, transform_indices = @transform_4, window_bounds = array<i64: 1, 128>}, {pipeline_mode = #tpu.pipeline_mode<synchronous>, transform_indices = @transform_5, window_bounds = array<i64: 128, 8>}, {pipeline_mode = #tpu.pipeline_mode<synchronous>, transform_indices = @transform_6, window_bounds = array<i64: 1, 8>}, {transform_indices = @transform_7, window_bounds = array<i64: 128, 8>}]} {
    %c0 = arith.constant 0 : index
    %c0_0 = arith.constant 0 : index
    %0 = vector.load %arg1[%c0, %c0_0] : memref<128x16xf32, #tpu.memory_space<vmem>>, vector<128x16xf32>
    %c0_1 = arith.constant 0 : index
    %c0_2 = arith.constant 0 : index
    %1 = vector.load %arg2[%c0_1, %c0_2] : memref<16x128xf32, #tpu.memory_space<vmem>>, vector<16x128xf32>
    %cst = arith.constant dense<0.000000e+00> : vector<128x128xf32>
    %2 = tpu.matmul %0, %1, %cst {dimension_numbers = #tpu.dot_dimension_numbers<[1], [0], [0], [1], [0, 0, 1, 1], [], []>} : vector<128x16xf32>, vector<16x128xf32>, vector<128x128xf32> -> vector<128x128xf32>
    %c0_3 = arith.constant 0 : index
    %c0_4 = arith.constant 0 : index
    %3 = vector.load %arg3[%c0_3, %c0_4] : memref<1x128xf32, #tpu.memory_space<vmem>>, vector<1x128xf32>
    %4 = vector.broadcast %3 : vector<1x128xf32> to vector<128x128xf32>
    %5 = arith.addf %2, %4 : vector<128x128xf32>
    %6 = math.tanh %5 : vector<128x128xf32>
    %c0_5 = arith.constant 0 : index
    %c0_6 = arith.constant 0 : index
    %7 = vector.load %arg4[%c0_5, %c0_6] : memref<128x128xf32, #tpu.memory_space<vmem>>, vector<128x128xf32>
    %cst_7 = arith.constant dense<0.000000e+00> : vector<128x128xf32>
    %8 = tpu.matmul %6, %7, %cst_7 {dimension_numbers = #tpu.dot_dimension_numbers<[1], [0], [0], [1], [0, 0, 1, 1], [], []>} : vector<128x128xf32>, vector<128x128xf32>, vector<128x128xf32> -> vector<128x128xf32>
    %c0_8 = arith.constant 0 : index
    %c0_9 = arith.constant 0 : index
    %9 = vector.load %arg5[%c0_8, %c0_9] : memref<1x128xf32, #tpu.memory_space<vmem>>, vector<1x128xf32>
    %10 = vector.broadcast %9 : vector<1x128xf32> to vector<128x128xf32>
    %11 = arith.addf %8, %10 : vector<128x128xf32>
    %12 = math.tanh %11 : vector<128x128xf32>
    %c0_10 = arith.constant 0 : index
    %c0_11 = arith.constant 0 : index
    %13 = vector.load %arg6[%c0_10, %c0_11] : memref<128x8xf32, #tpu.memory_space<vmem>>, vector<128x8xf32>
    %cst_12 = arith.constant dense<0.000000e+00> : vector<128x8xf32>
    %14 = tpu.matmul %12, %13, %cst_12 {dimension_numbers = #tpu.dot_dimension_numbers<[1], [0], [0], [1], [0, 0, 1, 1], [], []>} : vector<128x128xf32>, vector<128x8xf32>, vector<128x8xf32> -> vector<128x8xf32>
    %c0_13 = arith.constant 0 : index
    %c0_14 = arith.constant 0 : index
    %15 = vector.load %arg7[%c0_13, %c0_14] : memref<1x8xf32, #tpu.memory_space<vmem>>, vector<1x8xf32>
    %16 = vector.broadcast %15 : vector<1x8xf32> to vector<128x8xf32>
    %17 = arith.addf %14, %16 : vector<128x8xf32>
    %c0_15 = arith.constant 0 : index
    %c0_16 = arith.constant 0 : index
    %18 = vector.load %arg8[%c0_15, %c0_16] : memref<128x8xf32, #tpu.memory_space<vmem>>, vector<128x8xf32>
    tpu.vector_store %arg8[%c0_15, %c0_16], %17 {strides = array<i32>} : memref<128x8xf32, #tpu.memory_space<vmem>>, vector<128x8xf32>,
    return
  }
  func.func @transform_0(%arg0: i32) -> (i32, i32) {
    %c0_i32 = arith.constant 0 : i32
    %c0_i32_0 = arith.constant 0 : i32
    return %arg0, %c0_i32 : i32, i32
  }
  func.func @transform_1(%arg0: i32) -> (i32, i32) {
    %c0_i32 = arith.constant 0 : i32
    %c0_i32_0 = arith.constant 0 : i32
    %c0_i32_1 = arith.constant 0 : i32
    return %c0_i32, %c0_i32_0 : i32, i32
  }
  func.func @transform_2(%arg0: i32) -> (i32, i32) {
    %c0_i32 = arith.constant 0 : i32
    %c0_i32_0 = arith.constant 0 : i32
    %c0_i32_1 = arith.constant 0 : i32
    return %c0_i32, %c0_i32_0 : i32, i32
  }
  func.func @transform_3(%arg0: i32) -> (i32, i32) {
    %c0_i32 = arith.constant 0 : i32
    %c0_i32_0 = arith.constant 0 : i32
    %c0_i32_1 = arith.constant 0 : i32
    return %c0_i32, %c0_i32_0 : i32, i32
  }
  func.func @transform_4(%arg0: i32) -> (i32, i32) {
    %c0_i32 = arith.constant 0 : i32
    %c0_i32_0 = arith.constant 0 : i32
    %c0_i32_1 = arith.constant 0 : i32
    return %c0_i32, %c0_i32_0 : i32, i32
  }
  func.func @transform_5(%arg0: i32) -> (i32, i32) {
    %c0_i32 = arith.constant 0 : i32
    %c0_i32_0 = arith.constant 0 : i32
    %c0_i32_1 = arith.constant 0 : i32
    return %c0_i32, %c0_i32_0 : i32, i32
  }
  func.func @transform_6(%arg0: i32) -> (i32, i32) {
    %c0_i32 = arith.constant 0 : i32
    %c0_i32_0 = arith.constant 0 : i32
    %c0_i32_1 = arith.constant 0 : i32
    return %c0_i32, %c0_i32_0 : i32, i32
  }
  func.func @transform_7(%arg0: i32) -> (i32, i32) {
    %c0_i32 = arith.constant 0 : i32
    %c0_i32_0 = arith.constant 0 : i32
    return %arg0, %c0_i32 : i32, i32
  }
}

module attributes {stable_mosaic.version = 11 : i64} {
  func.func @_mlp_policy_kernel(%arg0: i32, %arg1: memref<128x16xf32, #tpu.memory_space<vmem>>, %arg2: memref<16x128xf32, #tpu.memory_space<vmem>>, %arg3: memref<1x128xf32, #tpu.memory_space<vmem>>, %arg4: memref<128x128xf32, #tpu.memory_space<vmem>>, %arg5: memref<1x128xf32, #tpu.memory_space<vmem>>, %arg6: memref<128x8xf32, #tpu.memory_space<vmem>>, %arg7: memref<1x8xf32, #tpu.memory_space<vmem>>, %arg8: memref<128x8xf32, #tpu.memory_space<vmem>>) attributes {dimension_semantics = [#tpu.dimension_semantics<parallel>], iteration_bounds = array<i64: 1>, scalar_prefetch = 0 : i64, scratch_operands = 0 : i64, tpu.core_type = #tpu.core_type<tc>, window_params = [{transform_indices = @transform_0, window_bounds = array<i64: 128, 16>}, {pipeline_mode = #tpu.pipeline_mode<synchronous>, transform_indices = @transform_1, window_bounds = array<i64: 16, 128>}, {pipeline_mode = #tpu.pipeline_mode<synchronous>, transform_indices = @transform_2, window_bounds = array<i64: 1, 128>}, {pipeline_mode = #tpu.pipeline_mode<synchronous>, transform_indices = @transform_3, window_bounds = array<i64: 128, 128>}, {pipeline_mode = #tpu.pipeline_mode<synchronous>, transform_indices = @transform_4, window_bounds = array<i64: 1, 128>}, {pipeline_mode = #tpu.pipeline_mode<synchronous>, transform_indices = @transform_5, window_bounds = array<i64: 128, 8>}, {pipeline_mode = #tpu.pipeline_mode<synchronous>, transform_indices = @transform_6, window_bounds = array<i64: 1, 8>}, {transform_indices = @transform_7, window_bounds = array<i64: 128, 8>}]} {
    %c0 = arith.constant 0 : index
    %c0_0 = arith.constant 0 : index
    %0 = vector.load %arg1[%c0, %c0_0] : memref<128x16xf32, #tpu.memory_space<vmem>>, vector<128x16xf32>
    %c0_1 = arith.constant 0 : index
    %c0_2 = arith.constant 0 : index
    %1 = vector.load %arg2[%c0_1, %c0_2] : memref<16x128xf32, #tpu.memory_space<vmem>>, vector<16x128xf32>
    %cst = arith.constant dense<0.000000e+00> : vector<128x128xf32>
    %2 = tpu.matmul %0, %1, %cst {dimension_numbers = #tpu.dot_dimension_numbers<[1], [0], [0], [1], [0, 0, 1, 1], [], []>} : vector<128x16xf32>, vector<16x128xf32>, vector<128x128xf32> -> vector<128x128xf32>
    %c0_3 = arith.constant 0 : index
    %c0_4 = arith.constant 0 : index
    %3 = vector.load %arg3[%c0_3, %c0_4] : memref<1x128xf32, #tpu.memory_space<vmem>>, vector<1x128xf32>
    %4 = vector.broadcast %3 : vector<1x128xf32> to vector<128x128xf32>
    %5 = arith.addf %2, %4 : vector<128x128xf32>
    %6 = math.tanh %5 : vector<128x128xf32>
    %c0_5 = arith.constant 0 : index
    %c0_6 = arith.constant 0 : index
    %7 = vector.load %arg4[%c0_5, %c0_6] : memref<128x128xf32, #tpu.memory_space<vmem>>, vector<128x128xf32>
    %cst_7 = arith.constant dense<0.000000e+00> : vector<128x128xf32>
    %8 = tpu.matmul %6, %7, %cst_7 {dimension_numbers = #tpu.dot_dimension_numbers<[1], [0], [0], [1], [0, 0, 1, 1], [], []>} : vector<128x128xf32>, vector<128x128xf32>, vector<128x128xf32> -> vector<128x128xf32>
    %c0_8 = arith.constant 0 : index
    %c0_9 = arith.constant 0 : index
    %9 = vector.load %arg5[%c0_8, %c0_9] : memref<1x128xf32, #tpu.memory_space<vmem>>, vector<1x128xf32>
    %10 = vector.broadcast %9 : vector<1x128xf32> to vector<128x128xf32>
    %11 = arith.addf %8, %10 : vector<128x128xf32>
    %12 = math.tanh %11 : vector<128x128xf32>
    %c0_10 = arith.constant 0 : index
    %c0_11 = arith.constant 0 : index
    %13 = vector.load %arg6[%c0_10, %c0_11] : memref<128x8xf32, #tpu.memory_space<vmem>>, vector<128x8xf32>
    %cst_12 = arith.constant dense<0.000000e+00> : vector<128x8xf32>
    %14 = tpu.matmul %12, %13, %cst_12 {dimension_numbers = #tpu.dot_dimension_numbers<[1], [0], [0], [1], [0, 0, 1, 1], [], []>} : vector<128x128xf32>, vector<128x8xf32>, vector<128x8xf32> -> vector<128x8xf32>
    %c0_13 = arith.constant 0 : index
    %c0_14 = arith.constant 0 : index
    %15 = vector.load %arg7[%c0_13, %c0_14] : memref<1x8xf32, #tpu.memory_space<vmem>>, vector<1x8xf32>
    %16 = vector.broadcast %15 : vector<1x8xf32> to vector<128x8xf32>
    %17 = arith.addf %14, %16 : vector<128x8xf32>
    %c0_15 = arith.constant 0 : index
    %c0_16 = arith.constant 0 : index
    %18 = vector.load %arg8[%c0_15, %c0_16] : memref<128x8xf32, #tpu.memory_space<vmem>>, vector<128x8xf32>
    tpu.vector_store %arg8[%c0_15, %c0_16], %17 {strides = array<i32>} : memref<128x8xf32, #tpu.memory_space<vmem>>, vector<128x8xf32>,
    return
  }
  func.func @transform_0(%arg0: i32) -> (i32, i32) {
    %c0_i32 = arith.constant 0 : i32
    %c0_i32_0 = arith.constant 0 : i32
    return %arg0, %c0_i32 : i32, i32
  }
  func.func @transform_1(%arg0: i32) -> (i32, i32) {
    %c0_i32 = arith.constant 0 : i32
    %c0_i32_0 = arith.constant 0 : i32
    %c0_i32_1 = arith.constant 0 : i32
    return %c0_i32, %c0_i32_0 : i32, i32
  }
  func.func @transform_2(%arg0: i32) -> (i32, i32) {
    %c0_i32 = arith.constant 0 : i32
    %c0_i32_0 = arith.constant 0 : i32
    %c0_i32_1 = arith.constant 0 : i32
    return %c0_i32, %c0_i32_0 : i32, i32
  }
  func.func @transform_3(%arg0: i32) -> (i32, i32) {
    %c0_i32 = arith.constant 0 : i32
    %c0_i32_0 = arith.constant 0 : i32
    %c0_i32_1 = arith.constant 0 : i32
    return %c0_i32, %c0_i32_0 : i32, i32
  }
  func.func @transform_4(%arg0: i32) -> (i32, i32) {
    %c0_i32 = arith.constant 0 : i32
    %c0_i32_0 = arith.constant 0 : i32
    %c0_i32_1 = arith.constant 0 : i32
    return %c0_i32, %c0_i32_0 : i32, i32
  }
  func.func @transform_5(%arg0: i32) -> (i32, i32) {
    %c0_i32 = arith.constant 0 : i32
    %c0_i32_0 = arith.constant 0 : i32
    %c0_i32_1 = arith.constant 0 : i32
    return %c0_i32, %c0_i32_0 : i32, i32
  }
  func.func @transform_6(%arg0: i32) -> (i32, i32) {
    %c0_i32 = arith.constant 0 : i32
    %c0_i32_0 = arith.constant 0 : i32
    %c0_i32_1 = arith.constant 0 : i32
    return %c0_i32, %c0_i32_0 : i32, i32
  }
  func.func @transform_7(%arg0: i32) -> (i32, i32) {
    %c0_i32 = arith.constant 0 : i32
    %c0_i32_0 = arith.constant 0 : i32
    return %arg0, %c0_i32 : i32, i32
  }
}

</mosaic_0001>

<bundles_post_ra>
// kernel: tpu_custom_call.1
= control target key start
LH: loop header
LB: loop body
LE: loop exit
PB: predicated region body
PF: predicated region fallthrough
CT: control target
= control target key end

     0   :  { %vm51_vm0 = vcmask 130048   ;;  %vm613_vm1 = vcmask 64512   ;;  %s1322_s1 = inlined_call_operand.vmem [shape: f32[16,128], index: 1, kind: input, shape index: {}]   ;;  %s1323_s0 = inlined_call_operand.vmem [shape: f32[128,16], index: 0, kind: input, shape index: {}]   ;;  %s1324_s3 = inlined_call_operand.vmem [shape: f32[128,128], index: 3, kind: input, shape index: {}]   ;;  %s1325_s5 = inlined_call_operand.vmem [shape: f32[128,8], index: 5, kind: input, shape index: {}]   ;;  %s1326_s2 = inlined_call_operand.vmem [shape: f32[1,128], index: 2, kind: input, shape index: {}]   ;;  %s1327_s4 = inlined_call_operand.vmem [shape: f32[1,128], index: 4, kind: input, shape index: {}]   ;;  %s1328_s6 = inlined_call_operand.vmem [shape: f32[1,8], index: 6, kind: input, shape index: {}]   ;;  %s1329_s7 = inlined_call_operand.vmem [shape: f32[128,8], index: 7, kind: output, shape index: {}]  }
   0x1   :  { %v42_v0 = vld [vmem:[%s1322_s1] sm:$0xff]  ;;  %v43_v1 = vld [vmem:[%s1322_s1 + $0x8] sm:$0xff]  ;;  %v28_v5 = vld [vmem:[%s1323_s0 + $0x10] sm:$0xff] }
   0x2   :  { %v26_v2 = vld [vmem:[%s1323_s0] sm:$0xff]  ;;  %v875_v3 = vpack.c.bf16 %v43_v1, %v42_v0  ;;  %v27_v4 = vld [vmem:[%s1323_s0 + $0x8] sm:$0xff]  ;;  %v263_v8 = vld [vmem:[%s1324_s3 + $0x10] sm:$0xff] }
   0x3   :  { %739 = vmatprep.mubr.msk.f32.mxu0 %vm51_vm0, %v26_v2  ;;  %v261_v6 = vld [vmem:[%s1324_s3] sm:$0xff]  ;;  %v262_v7 = vld [vmem:[%s1324_s3 + $0x8] sm:$0xff]  ;;  %v264_v10 = vld [vmem:[%s1324_s3 + $0x18] sm:$0xff] }
   0x4   :  { %876 = vmatprep.subr.bf16.mxu0 %v875_v3  ;;  %v879_v9 = vpack.c.bf16 %v262_v7, %v261_v6  ;;  %v29_v11 = vld [vmem:[%s1323_s0 + $0x18] sm:$0xff]  ;;  %v883_v12 = vpack.c.bf16 %v264_v10, %v263_v8  ;;  %v265_v13 = vld [vmem:[%s1324_s3 + $0x20] sm:$0xff]  ;;  %v266_v14 = vld [vmem:[%s1324_s3 + $0x28] sm:$0xff] }
   0x5   :  { %878 = vmatpush3.bf16.msra.mxu0 %v875_v3  ;;  %v30_v15 = vld [vmem:[%s1323_s0 + $0x20] sm:$0xff]  ;;  %v887_v16 = vpack.c.bf16 %v266_v14, %v265_v13  ;;  %v31_v17 = vld [vmem:[%s1323_s0 + $0x28] sm:$0xff]  ;;  %v267_v18 = vld [vmem:[%s1324_s3 + $0x30] sm:$0xff] }
   0x6   :  { %880 = vmatprep.subr.bf16.mxu1 %v879_v9  ;;  %v268_v19 = vld [vmem:[%s1324_s3 + $0x38] sm:$0xff]  ;;  %v32_v20 = vld [vmem:[%s1323_s0 + $0x30] sm:$0xff]  ;;  %v34_v23 = vld [vmem:[%s1323_s0 + $0x40] sm:$0xff] }
   0x7   :  { %882 = vmatpush3.bf16.msra.mxu1 %v879_v9  ;;  %v891_v21 = vpack.c.bf16 %v268_v19, %v267_v18  ;;  %v33_v22 = vld [vmem:[%s1323_s0 + $0x38] sm:$0xff]  ;;  %v35_v24 = vld [vmem:[%s1323_s0 + $0x48] sm:$0xff]  ;;  %v36_v25 = vld [vmem:[%s1323_s0 + $0x50] sm:$0xff] }
   0x8   :  { %740 = vmatmul.mubr.msk.f32.vlgmr.msra.gmra.mrb[0].mxu0 %vm51_vm0, %v27_v4  ;;  %884 = vmatprep.subr.bf16.mxu1 %v883_v12  ;;  %v37_v26 = vld [vmem:[%s1323_s0 + $0x58] sm:$0xff]  ;;  %v38_v27 = vld [vmem:[%s1323_s0 + $0x60] sm:$0xff]  ;;  %v39_v28 = vld [vmem:[%s1323_s0 + $0x68] sm:$0xff] }
   0x9   :  { %742 = vmatprep.mubr.msk.f32.mxu0 %vm51_vm0, %v28_v5  ;;  %v40_v29 = vld [vmem:[%s1323_s0 + $0x70] sm:$0xff]  ;;  %v41_v30 = vld [vmem:[%s1323_s0 + $0x78] sm:$0xff]  ;;  %v269_v31 = vld [vmem:[%s1324_s3 + $0x40] sm:$0xff] }
   0xa   :  { %v270_v32 = vld [vmem:[%s1324_s3 + $0x48] sm:$0xff]  ;;  %v271_v34 = vld [vmem:[%s1324_s3 + $0x50] sm:$0xff]  ;;  %v272_v35 = vld [vmem:[%s1324_s3 + $0x58] sm:$0xff] }
   0xb   :  { %886 = vmatpush3.bf16.msra.mxu1 %v883_v12  ;;  %v895_v33 = vpack.c.bf16 %v270_v32, %v269_v31  ;;  %v899_v36 = vpack.c.bf16 %v272_v35, %v271_v34  ;;  %v273_v37 = vld [vmem:[%s1324_s3 + $0x60] sm:$0xff]  ;;  %v274_v38 = vld [vmem:[%s1324_s3 + $0x68] sm:$0xff]  ;;  %v275_v40 = vld [vmem:[%s1324_s3 + $0x70] sm:$0xff] }
   0xc   :  { %743 = vmatmul.mubr.msk.f32.gmra.mrb[2].mxu0 %vm51_vm0, %v29_v11  ;;  %888 = vmatprep.subr.bf16.mxu1 %v887_v16  ;;  %v903_v39 = vpack.c.bf16 %v274_v38, %v273_v37  ;;  %v276_v41 = vld [vmem:[%s1324_s3 + $0x78] sm:$0xff]  ;;  %v445_v43 = vld [vmem:[%s1325_s5] sm:$0xff]  ;;  %v446_v44 = vld [vmem:[%s1325_s5 + $0x8] sm:$0xff] }
   0xd   :  { %745 = vmatprep.mubr.msk.f32.mxu0 %vm51_vm0, %v30_v15  ;;  %v907_v42 = vpack.c.bf16 %v276_v41, %v275_v40  ;;  %v447_v45 = vld [vmem:[%s1325_s5 + $0x10] sm:$0xff]  ;;  %v911_v46 = vpack.c.bf16 %v446_v44, %v445_v43  ;;  %v448_v47 = vld [vmem:[%s1325_s5 + $0x18] sm:$0xff]  ;;  %v449_v49 = vld [vmem:[%s1325_s5 + $0x20] sm:$0xff] }
   0xe   :  { %v915_v48 = vpack.c.bf16 %v448_v47, %v447_v45  ;;  %v450_v50 = vld [vmem:[%s1325_s5 + $0x28] sm:$0xff]  ;;  %v451_v52 = vld [vmem:[%s1325_s5 + $0x30] sm:$0xff]  ;;  %v452_v53 = vld [vmem:[%s1325_s5 + $0x38] sm:$0xff] }
   0xf   :  { %890 = vmatpush3.bf16.msra.mxu1 %v887_v16  ;;  %912 = vmatprep.subr.bf16.mxu0 %v911_v46  ;;  %v919_v51 = vpack.c.bf16 %v450_v50, %v449_v49  ;;  %v923_v54 = vpack.c.bf16 %v452_v53, %v451_v52  ;;  %v453_v55 = vld [vmem:[%s1325_s5 + $0x40] sm:$0xff]  ;;  %v454_v56 = vld [vmem:[%s1325_s5 + $0x48] sm:$0xff]  ;;  %v455_v43 = vld [vmem:[%s1325_s5 + $0x50] sm:$0xff] }
  0x10   :  { %746 = vmatmul.mubr.msk.f32.gmra.mrb[4].mxu0 %vm51_vm0, %v31_v17  ;;  %892 = vmatprep.subr.bf16.mxu1 %v891_v21  ;;  %v927_v57 = vpack.c.bf16 %v454_v56, %v453_v55  ;;  %v1198_v58 = vld [vmem:[%s1326_s2] ss:$0 sm:$0xff]  ;;  %v456_v44 = vld [vmem:[%s1325_s5 + $0x58] sm:$0xff]  ;;  %v458_v47 = vld [vmem:[%s1325_s5 + $0x68] sm:$0xff] }
  0x11   :  { %748 = vmatprep.mubr.msk.f32.mxu0 %vm51_vm0, %v32_v20  ;;  %914 = vmatpush3.bf16.msra.mxu0 %v911_v46  ;;  %v931_v45 = vpack.c.bf16 %v456_v44, %v455_v43  ;;  %v457_v46 = vld [vmem:[%s1325_s5 + $0x60] sm:$0xff]  ;;  %v459_v49 = vld [vmem:[%s1325_s5 + $0x70] sm:$0xff]  ;;  %v460_v50 = vld [vmem:[%s1325_s5 + $0x78] sm:$0xff] }
  0x12   :  { %916 = vmatprep.subr.bf16.mxu0 %v915_v48  ;;  %v1237_v52 = vld [vmem:[%s1327_s4] ss:$0 sm:$0xff] }
  0x13   :  { %894 = vmatpush3.bf16.msra.mxu1 %v891_v21 }
  0x14   :  { %749 = vmatmul.mubr.msk.f32.gmra.mrb[6].mxu0 %vm51_vm0, %v33_v22  ;;  %896 = vmatprep.subr.bf16.mxu1 %v895_v33 }
  0x15   :  { %751 = vmatprep.mubr.msk.f32.mxu0 %vm51_vm0, %v34_v23  ;;  %918 = vmatpush3.bf16.msra.mxu0 %v915_v48  ;;  %v935_v48 = vpack.c.bf16 %v458_v47, %v457_v46 }
  0x16   :  { %920 = vmatprep.subr.bf16.mxu0 %v919_v51 }
  0x17   :  { %898 = vmatpush3.bf16.msra.mxu1 %v895_v33 }
  0x18   :  { %752 = vmatmul.mubr.msk.f32.gmra.mrb[8].mxu0 %vm51_vm0, %v35_v24  ;;  %900 = vmatprep.subr.bf16.mxu1 %v899_v36 }
  0x19   :  { %754 = vmatprep.mubr.msk.f32.mxu0 %vm51_vm0, %v36_v25  ;;  %922 = vmatpush3.bf16.msra.mxu0 %v919_v51  ;;  %v939_v51 = vpack.c.bf16 %v460_v50, %v459_v49 }
  0x1a   :  { %924 = vmatprep.subr.bf16.mxu0 %v923_v54 }
  0x1b   :  { %902 = vmatpush3.bf16.msra.mxu1 %v899_v36 }
  0x1c   :  { %755 = vmatmul.mubr.msk.f32.gmra.mrb[10].mxu0 %vm51_vm0, %v37_v26  ;;  %904 = vmatprep.subr.bf16.mxu1 %v903_v39 }
  0x1d   :  { %757 = vmatprep.mubr.msk.f32.mxu0 %vm51_vm0, %v38_v27  ;;  %926 = vmatpush3.bf16.msra.mxu0 %v923_v54 }
  0x1e   :  { %928 = vmatprep.subr.bf16.mxu0 %v927_v57 }
  0x1f   :  { %906 = vmatpush3.bf16.msra.mxu1 %v903_v39 }
  0x20   :  { %758 = vmatmul.mubr.msk.f32.gmra.mrb[12].mxu0 %vm51_vm0, %v39_v28  ;;  %908 = vmatprep.subr.bf16.mxu1 %v907_v42 }
  0x21   :  { %760 = vmatprep.mubr.msk.f32.mxu0 %vm51_vm0, %v40_v29  ;;  %930 = vmatpush3.bf16.msra.mxu0 %v927_v57 }
  0x22   :  { %932 = vmatprep.subr.bf16.mxu0 %v931_v45 }
  0x23   :  { %910 = vmatpush3.bf16.msra.mxu1 %v907_v42 }
  0x24   :  { %761 = vmatmul.mubr.msk.f32.gmra.mrb[14].mxu0 %vm51_vm0, %v41_v30 }
  0x25   :  { %934 = vmatpush3.bf16.msra.mxu0 %v931_v45 }
  0x26   :  { %936 = vmatprep.subr.bf16.mxu0 %v935_v48 }
  0x29   :  { %938 = vmatpush3.bf16.msra.mxu0 %v935_v48 }
  0x2a   :  { %940 = vmatprep.subr.bf16.mxu0 %v939_v51 }
  0x2d   :  { %942 = vmatpush3.bf16.msra.mxu0 %v939_v51 }
  0xdb   :  { %v741_v59 = vpop.f32.mrb[0].mxu0 }
  0xdc   :  { %v172_v60 = vadd.f32 %v741_v59, %v1198_v58  ;;  %v166_v61 = vpop.f32.mrb[1].mxu0 }
  0xdd   :  { %v167_v62 = vadd.f32 %v1198_v58, %v166_v61 }
  0xdf   :  { %943 = vtanh.f32 %v167_v62  ;;  %v744_v63 = vpop.f32.mrb[2].mxu0 }
  0xe0   :  { %945 = vtanh.f32 %v172_v60  ;;  %v182_v0 = vadd.f32 %v744_v63, %v1198_v58  ;;  %v176_v1 = vpop.f32.mrb[3].mxu0 }
  0xe1   :  { %v177_v2 = vadd.f32 %v1198_v58, %v176_v1 }
  0xe3   :  { %947 = vtanh.f32 %v177_v2  ;;  %v747_v3 = vpop.f32.mrb[4].mxu0 }
  0xe4   :  { %949 = vtanh.f32 %v182_v0  ;;  %v192_v4 = vadd.f32 %v747_v3, %v1198_v58  ;;  %v186_v5 = vpop.f32.mrb[5].mxu0 }
  0xe5   :  { %v187_v6 = vadd.f32 %v1198_v58, %v186_v5 }
  0xe7   :  { %951 = vtanh.f32 %v187_v6  ;;  %v750_v7 = vpop.f32.mrb[6].mxu0 }
  0xe8   :  { %953 = vtanh.f32 %v192_v4  ;;  %v202_v8 = vadd.f32 %v750_v7, %v1198_v58  ;;  %v196_v9 = vpop.f32.mrb[7].mxu0 }
  0xe9   :  { %v944_v10 = vpop.eup %943  ;;  %v197_v11 = vadd.f32 %v1198_v58, %v196_v9 }
  0xea   :  { %v946_v12 = vpop.eup %945  ;;  %795 = vmatprep.mubr.f32.mxu1 %v944_v10 }
  0xeb   :  { %955 = vtanh.f32 %v197_v11  ;;  %v753_v13 = vpop.f32.mrb[8].mxu0  ;;  %796 = vmatmul.mubr.f32.vlgmr.msra.gmra.mrb[0].mxu1 %v946_v12 }
  0xec   :  { %957 = vtanh.f32 %v202_v8  ;;  %v212_v14 = vadd.f32 %v753_v13, %v1198_v58  ;;  %v206_v15 = vpop.f32.mrb[9].mxu0 }
  0xed   :  { %v948_v16 = vpop.eup %947  ;;  %v207_v17 = vadd.f32 %v1198_v58, %v206_v15 }
  0xee   :  { %v950_v18 = vpop.eup %949  ;;  %798 = vmatprep.mubr.f32.mxu1 %v948_v16 }
  0xef   :  { %959 = vtanh.f32 %v207_v17  ;;  %v756_v19 = vpop.f32.mrb[10].mxu0  ;;  %799 = vmatmul.mubr.f32.gmra.mrb[2].mxu1 %v950_v18 }
  0xf0   :  { %961 = vtanh.f32 %v212_v14  ;;  %v222_v20 = vadd.f32 %v756_v19, %v1198_v58  ;;  %v216_v21 = vpop.f32.mrb[11].mxu0 }
  0xf1   :  { %v952_v22 = vpop.eup %951  ;;  %v217_v23 = vadd.f32 %v1198_v58, %v216_v21 }
  0xf2   :  { %v954_v24 = vpop.eup %953  ;;  %801 = vmatprep.mubr.f32.mxu1 %v952_v22 }
  0xf3   :  { %963 = vtanh.f32 %v217_v23  ;;  %v759_v25 = vpop.f32.mrb[12].mxu0  ;;  %802 = vmatmul.mubr.f32.gmra.mrb[4].mxu1 %v954_v24 }
  0xf4   :  { %965 = vtanh.f32 %v222_v20  ;;  %v232_v26 = vadd.f32 %v759_v25, %v1198_v58  ;;  %v226_v27 = vpop.f32.mrb[13].mxu0 }
  0xf5   :  { %v956_v28 = vpop.eup %955  ;;  %v227_v29 = vadd.f32 %v1198_v58, %v226_v27 }
  0xf6   :  { %v958_v30 = vpop.eup %957  ;;  %804 = vmatprep.mubr.f32.mxu1 %v956_v28 }
  0xf7   :  { %967 = vtanh.f32 %v227_v29  ;;  %v762_v31 = vpop.f32.mrb[14].mxu0  ;;  %805 = vmatmul.mubr.f32.gmra.mrb[6].mxu1 %v958_v30 }
  0xf8   :  { %969 = vtanh.f32 %v232_v26  ;;  %v242_v32 = vadd.f32 %v762_v31, %v1198_v58  ;;  %v236_v33 = vpop.f32.mrb[15].mxu0 }
  0xf9   :  { %v960_v34 = vpop.eup %959  ;;  %v237_v35 = vadd.f32 %v1198_v58, %v236_v33 }
  0xfa   :  { %v962_v36 = vpop.eup %961  ;;  %807 = vmatprep.mubr.f32.mxu1 %v960_v34 }
  0xfb   :  { %971 = vtanh.f32 %v237_v35  ;;  %808 = vmatmul.mubr.f32.gmra.mrb[8].mxu1 %v962_v36 }
  0xfc   :  { %973 = vtanh.f32 %v242_v32 }
  0xfd   :  { %v964_v37 = vpop.eup %963 }
  0xfe   :  { %v966_v38 = vpop.eup %965  ;;  %810 = vmatprep.mubr.f32.mxu1 %v964_v37  ;;  %v652_v37 = vld [vmem:[%s1328_s6] ss:$0 sm:$0xff] }
  0xff   :  { %811 = vmatmul.mubr.f32.gmra.mrb[10].mxu1 %v966_v38 }
 0x101   :  { %v968_v39 = vpop.eup %967 }
 0x102   :  { %v970_v40 = vpop.eup %969  ;;  %813 = vmatprep.mubr.f32.mxu1 %v968_v39 }
 0x103   :  { %814 = vmatmul.mubr.f32.gmra.mrb[12].mxu1 %v970_v40 }
 0x105   :  { %v972_v41 = vpop.eup %971 }
 0x106   :  { %v974_v42 = vpop.eup %973  ;;  %816 = vmatprep.mubr.f32.mxu1 %v972_v41 }
 0x107   :  { %817 = vmatmul.mubr.f32.gmra.mrb[14].mxu1 %v974_v42 }
 0x1be   :  { %v797_v53 = vpop.f32.mrb[0].mxu1 }
 0x1bf   :  { %v356_v54 = vadd.f32 %v797_v53, %v1237_v52  ;;  %v350_v55 = vpop.f32.mrb[1].mxu1 }
 0x1c0   :  { %v351_v56 = vadd.f32 %v1237_v52, %v350_v55 }
 0x1c2   :  { %975 = vtanh.f32 %v351_v56  ;;  %v800_v57 = vpop.f32.mrb[2].mxu1 }
 0x1c3   :  { %977 = vtanh.f32 %v356_v54  ;;  %v366_v58 = vadd.f32 %v800_v57, %v1237_v52  ;;  %v360_v59 = vpop.f32.mrb[3].mxu1 }
 0x1c4   :  { %v361_v60 = vadd.f32 %v1237_v52, %v360_v59 }
 0x1c6   :  { %979 = vtanh.f32 %v361_v60  ;;  %v803_v61 = vpop.f32.mrb[4].mxu1 }
 0x1c7   :  { %981 = vtanh.f32 %v366_v58  ;;  %v376_v62 = vadd.f32 %v803_v61, %v1237_v52  ;;  %v370_v63 = vpop.f32.mrb[5].mxu1 }
 0x1c8   :  { %v371_v0 = vadd.f32 %v1237_v52, %v370_v63 }
 0x1ca   :  { %983 = vtanh.f32 %v371_v0  ;;  %v806_v1 = vpop.f32.mrb[6].mxu1 }
 0x1cb   :  { %985 = vtanh.f32 %v376_v62  ;;  %v386_v2 = vadd.f32 %v806_v1, %v1237_v52  ;;  %v380_v3 = vpop.f32.mrb[7].mxu1 }
 0x1cc   :  { %v976_v4 = vpop.eup %975  ;;  %v381_v5 = vadd.f32 %v1237_v52, %v380_v3 }
 0x1cd   :  { %v978_v6 = vpop.eup %977  ;;  %851 = vmatprep.mubr.f32.mxu0 %v976_v4 }
 0x1ce   :  { %987 = vtanh.f32 %v381_v5  ;;  %v809_v7 = vpop.f32.mrb[8].mxu1  ;;  %852 = vmatmul.mubr.f32.vlgmr.msra.gmra.mrb[16].mxu0 %v978_v6 }
 0x1cf   :  { %989 = vtanh.f32 %v386_v2  ;;  %v396_v8 = vadd.f32 %v809_v7, %v1237_v52  ;;  %v390_v9 = vpop.f32.mrb[9].mxu1 }
 0x1d0   :  { %v980_v10 = vpop.eup %979  ;;  %v391_v11 = vadd.f32 %v1237_v52, %v390_v9 }
 0x1d1   :  { %v982_v12 = vpop.eup %981  ;;  %854 = vmatprep.mubr.f32.mxu0 %v980_v10 }
 0x1d2   :  { %991 = vtanh.f32 %v391_v11  ;;  %v812_v13 = vpop.f32.mrb[10].mxu1  ;;  %855 = vmatmul.mubr.f32.gmra.mrb[18].mxu0 %v982_v12 }
 0x1d3   :  { %993 = vtanh.f32 %v396_v8  ;;  %v406_v14 = vadd.f32 %v812_v13, %v1237_v52  ;;  %v400_v15 = vpop.f32.mrb[11].mxu1 }
 0x1d4   :  { %v984_v16 = vpop.eup %983  ;;  %v401_v17 = vadd.f32 %v1237_v52, %v400_v15 }
 0x1d5   :  { %v986_v18 = vpop.eup %985  ;;  %857 = vmatprep.mubr.f32.mxu0 %v984_v16 }
 0x1d6   :  { %995 = vtanh.f32 %v401_v17  ;;  %v815_v19 = vpop.f32.mrb[12].mxu1  ;;  %858 = vmatmul.mubr.f32.gmra.mrb[20].mxu0 %v986_v18 }
 0x1d7   :  { %997 = vtanh.f32 %v406_v14  ;;  %v416_v20 = vadd.f32 %v815_v19, %v1237_v52  ;;  %v410_v21 = vpop.f32.mrb[13].mxu1 }
 0x1d8   :  { %v988_v22 = vpop.eup %987  ;;  %v411_v23 = vadd.f32 %v1237_v52, %v410_v21 }
 0x1d9   :  { %v990_v24 = vpop.eup %989  ;;  %860 = vmatprep.mubr.f32.mxu0 %v988_v22 }
 0x1da   :  { %999 = vtanh.f32 %v411_v23  ;;  %v818_v25 = vpop.f32.mrb[14].mxu1  ;;  %861 = vmatmul.mubr.f32.gmra.mrb[22].mxu0 %v990_v24 }
 0x1db   :  { %1001 = vtanh.f32 %v416_v20  ;;  %v426_v26 = vadd.f32 %v818_v25, %v1237_v52  ;;  %v420_v27 = vpop.f32.mrb[15].mxu1 }
 0x1dc   :  { %v992_v28 = vpop.eup %991  ;;  %v421_v29 = vadd.f32 %v1237_v52, %v420_v27 }
 0x1dd   :  { %v994_v30 = vpop.eup %993  ;;  %863 = vmatprep.mubr.f32.mxu0 %v992_v28 }
 0x1de   :  { %1003 = vtanh.f32 %v421_v29  ;;  %864 = vmatmul.mubr.f32.gmra.mrb[24].mxu0 %v994_v30 }
 0x1df   :  { %1005 = vtanh.f32 %v426_v26 }
 0x1e0   :  { %v996_v31 = vpop.eup %995 }
 0x1e1   :  { %v998_v32 = vpop.eup %997  ;;  %866 = vmatprep.mubr.f32.mxu0 %v996_v31 }
 0x1e2   :  { %867 = vmatmul.mubr.f32.gmra.mrb[26].mxu0 %v998_v32 }
 0x1e4   :  { %v1000_v33 = vpop.eup %999 }
 0x1e5   :  { %v1002_v34 = vpop.eup %1001  ;;  %869 = vmatprep.mubr.f32.mxu0 %v1000_v33 }
 0x1e6   :  { %870 = vmatmul.mubr.f32.gmra.mrb[28].mxu0 %v1002_v34 }
 0x1e8   :  { %v1004_v35 = vpop.eup %1003 }
 0x1e9   :  { %v1006_v36 = vpop.eup %1005  ;;  %872 = vmatprep.mubr.f32.mxu0 %v1004_v35 }
 0x1ea   :  { %873 = vmatmul.mubr.f32.gmra.mrb[30].mxu0 %v1006_v36 }
 0x2a1   :  { %v853_v38 = vpop.f32.mrb[16].mxu0 }
 0x2a2   :  { %v540_v39 = vadd.f32 %v853_v38, %v652_v37  ;;  %v534_v40 = vpop.f32.mrb[17].mxu0 }
 0x2a3   :  { %v535_v41 = vadd.f32 %v652_v37, %v534_v40 }
 0x2a4   :  { %615 = vst.msk [vmem:[%s1329_s7 + $0x8] sm:$0xff] %vm613_vm1, %v540_v39 }
 0x2a5   :  { %614 = vst.msk [vmem:[%s1329_s7] sm:$0xff] %vm613_vm1, %v535_v41  ;;  %v856_v42 = vpop.f32.mrb[18].mxu0 }
 0x2a6   :  { %v550_v43 = vadd.f32 %v856_v42, %v652_v37  ;;  %v544_v44 = vpop.f32.mrb[19].mxu0 }
 0x2a7   :  { %v545_v45 = vadd.f32 %v652_v37, %v544_v44 }
 0x2a8   :  { %617 = vst.msk [vmem:[%s1329_s7 + $0x18] sm:$0xff] %vm613_vm1, %v550_v43 }
 0x2a9   :  { %616 = vst.msk [vmem:[%s1329_s7 + $0x10] sm:$0xff] %vm613_vm1, %v545_v45  ;;  %v859_v46 = vpop.f32.mrb[20].mxu0 }
 0x2aa   :  { %v560_v47 = vadd.f32 %v859_v46, %v652_v37  ;;  %v554_v48 = vpop.f32.mrb[21].mxu0 }
 0x2ab   :  { %v555_v49 = vadd.f32 %v652_v37, %v554_v48 }
 0x2ac   :  { %619 = vst.msk [vmem:[%s1329_s7 + $0x28] sm:$0xff] %vm613_vm1, %v560_v47 }
 0x2ad   :  { %618 = vst.msk [vmem:[%s1329_s7 + $0x20] sm:$0xff] %vm613_vm1, %v555_v49  ;;  %v862_v50 = vpop.f32.mrb[22].mxu0 }
 0x2ae   :  { %v570_v51 = vadd.f32 %v862_v50, %v652_v37  ;;  %v564_v52 = vpop.f32.mrb[23].mxu0 }
 0x2af   :  { %v565_v53 = vadd.f32 %v652_v37, %v564_v52 }
 0x2b0   :  { %621 = vst.msk [vmem:[%s1329_s7 + $0x38] sm:$0xff] %vm613_vm1, %v570_v51 }
 0x2b1   :  { %620 = vst.msk [vmem:[%s1329_s7 + $0x30] sm:$0xff] %vm613_vm1, %v565_v53  ;;  %v865_v54 = vpop.f32.mrb[24].mxu0 }
 0x2b2   :  { %v580_v55 = vadd.f32 %v865_v54, %v652_v37  ;;  %v574_v56 = vpop.f32.mrb[25].mxu0 }
 0x2b3   :  { %v575_v57 = vadd.f32 %v652_v37, %v574_v56 }
 0x2b4   :  { %623 = vst.msk [vmem:[%s1329_s7 + $0x48] sm:$0xff] %vm613_vm1, %v580_v55 }
 0x2b5   :  { %622 = vst.msk [vmem:[%s1329_s7 + $0x40] sm:$0xff] %vm613_vm1, %v575_v57  ;;  %v868_v58 = vpop.f32.mrb[26].mxu0 }
 0x2b6   :  { %v590_v59 = vadd.f32 %v868_v58, %v652_v37  ;;  %v584_v60 = vpop.f32.mrb[27].mxu0 }
 0x2b7   :  { %v585_v61 = vadd.f32 %v652_v37, %v584_v60 }
 0x2b8   :  { %625 = vst.msk [vmem:[%s1329_s7 + $0x58] sm:$0xff] %vm613_vm1, %v590_v59 }
 0x2b9   :  { %624 = vst.msk [vmem:[%s1329_s7 + $0x50] sm:$0xff] %vm613_vm1, %v585_v61  ;;  %v871_v62 = vpop.f32.mrb[28].mxu0 }
 0x2ba   :  { %v600_v63 = vadd.f32 %v871_v62, %v652_v37  ;;  %v594_v0 = vpop.f32.mrb[29].mxu0 }
 0x2bb   :  { %v595_v1 = vadd.f32 %v652_v37, %v594_v0 }
 0x2bc   :  { %627 = vst.msk [vmem:[%s1329_s7 + $0x68] sm:$0xff] %vm613_vm1, %v600_v63 }
 0x2bd   :  { %626 = vst.msk [vmem:[%s1329_s7 + $0x60] sm:$0xff] %vm613_vm1, %v595_v1  ;;  %v874_v2 = vpop.f32.mrb[30].mxu0 }
 0x2be   :  { %v610_v3 = vadd.f32 %v874_v2, %v652_v37  ;;  %v604_v4 = vpop.f32.mrb[31].mxu0 }
 0x2bf   :  { %v605_v5 = vadd.f32 %v652_v37, %v604_v4 }
 0x2c0   :  { %629 = vst.msk [vmem:[%s1329_s7 + $0x78] sm:$0xff] %vm613_vm1, %v610_v3 }
 0x2c1   :  { %628 = vst.msk [vmem:[%s1329_s7 + $0x70] sm:$0xff] %vm613_vm1, %v605_v5 }

// kernel: tpu_custom_call.1
= control target key start
LH: loop header
LB: loop body
LE: loop exit
PB: predicated region body
PF: predicated region fallthrough
CT: control target
= control target key end

     0   :  { %vm51_vm0 = vcmask 130048   ;;  %vm613_vm1 = vcmask 64512   ;;  %s1322_s1 = inlined_call_operand.vmem [shape: f32[16,128], index: 1, kind: input, shape index: {}]   ;;  %s1323_s0 = inlined_call_operand.vmem [shape: f32[128,16], index: 0, kind: input, shape index: {}]   ;;  %s1324_s3 = inlined_call_operand.vmem [shape: f32[128,128], index: 3, kind: input, shape index: {}]   ;;  %s1325_s5 = inlined_call_operand.vmem [shape: f32[128,8], index: 5, kind: input, shape index: {}]   ;;  %s1326_s2 = inlined_call_operand.vmem [shape: f32[1,128], index: 2, kind: input, shape index: {}]   ;;  %s1327_s4 = inlined_call_operand.vmem [shape: f32[1,128], index: 4, kind: input, shape index: {}]   ;;  %s1328_s6 = inlined_call_operand.vmem [shape: f32[1,8], index: 6, kind: input, shape index: {}]   ;;  %s1329_s7 = inlined_call_operand.vmem [shape: f32[128,8], index: 7, kind: output, shape index: {}]  }
   0x1   :  { %v42_v0 = vld [vmem:[%s1322_s1] sm:$0xff]  ;;  %v43_v1 = vld [vmem:[%s1322_s1 + $0x8] sm:$0xff]  ;;  %v28_v5 = vld [vmem:[%s1323_s0 + $0x10] sm:$0xff] }
   0x2   :  { %v26_v2 = vld [vmem:[%s1323_s0] sm:$0xff]  ;;  %v875_v3 = vpack.c.bf16 %v43_v1, %v42_v0  ;;  %v27_v4 = vld [vmem:[%s1323_s0 + $0x8] sm:$0xff]  ;;  %v263_v8 = vld [vmem:[%s1324_s3 + $0x10] sm:$0xff] }
   0x3   :  { %739 = vmatprep.mubr.msk.f32.mxu0 %vm51_vm0, %v26_v2  ;;  %v261_v6 = vld [vmem:[%s1324_s3] sm:$0xff]  ;;  %v262_v7 = vld [vmem:[%s1324_s3 + $0x8] sm:$0xff]  ;;  %v264_v10 = vld [vmem:[%s1324_s3 + $0x18] sm:$0xff] }
   0x4   :  { %876 = vmatprep.subr.bf16.mxu0 %v875_v3  ;;  %v879_v9 = vpack.c.bf16 %v262_v7, %v261_v6  ;;  %v29_v11 = vld [vmem:[%s1323_s0 + $0x18] sm:$0xff]  ;;  %v883_v12 = vpack.c.bf16 %v264_v10, %v263_v8  ;;  %v265_v13 = vld [vmem:[%s1324_s3 + $0x20] sm:$0xff]  ;;  %v266_v14 = vld [vmem:[%s1324_s3 + $0x28] sm:$0xff] }
   0x5   :  { %878 = vmatpush3.bf16.msra.mxu0 %v875_v3  ;;  %v30_v15 = vld [vmem:[%s1323_s0 + $0x20] sm:$0xff]  ;;  %v887_v16 = vpack.c.bf16 %v266_v14, %v265_v13  ;;  %v31_v17 = vld [vmem:[%s1323_s0 + $0x28] sm:$0xff]  ;;  %v267_v18 = vld [vmem:[%s1324_s3 + $0x30] sm:$0xff] }
   0x6   :  { %880 = vmatprep.subr.bf16.mxu1 %v879_v9  ;;  %v268_v19 = vld [vmem:[%s1324_s3 + $0x38] sm:$0xff]  ;;  %v32_v20 = vld [vmem:[%s1323_s0 + $0x30] sm:$0xff]  ;;  %v34_v23 = vld [vmem:[%s1323_s0 + $0x40] sm:$0xff] }
   0x7   :  { %882 = vmatpush3.bf16.msra.mxu1 %v879_v9  ;;  %v891_v21 = vpack.c.bf16 %v268_v19, %v267_v18  ;;  %v33_v22 = vld [vmem:[%s1323_s0 + $0x38] sm:$0xff]  ;;  %v35_v24 = vld [vmem:[%s1323_s0 + $0x48] sm:$0xff]  ;;  %v36_v25 = vld [vmem:[%s1323_s0 + $0x50] sm:$0xff] }
   0x8   :  { %740 = vmatmul.mubr.msk.f32.vlgmr.msra.gmra.mrb[0].mxu0 %vm51_vm0, %v27_v4  ;;  %884 = vmatprep.subr.bf16.mxu1 %v883_v12  ;;  %v37_v26 = vld [vmem:[%s1323_s0 + $0x58] sm:$0xff]  ;;  %v38_v27 = vld [vmem:[%s1323_s0 + $0x60] sm:$0xff]  ;;  %v39_v28 = vld [vmem:[%s1323_s0 + $0x68] sm:$0xff] }
   0x9   :  { %742 = vmatprep.mubr.msk.f32.mxu0 %vm51_vm0, %v28_v5  ;;  %v40_v29 = vld [vmem:[%s1323_s0 + $0x70] sm:$0xff]  ;;  %v41_v30 = vld [vmem:[%s1323_s0 + $0x78] sm:$0xff]  ;;  %v269_v31 = vld [vmem:[%s1324_s3 + $0x40] sm:$0xff] }
   0xa   :  { %v270_v32 = vld [vmem:[%s1324_s3 + $0x48] sm:$0xff]  ;;  %v271_v34 = vld [vmem:[%s1324_s3 + $0x50] sm:$0xff]  ;;  %v272_v35 = vld [vmem:[%s1324_s3 + $0x58] sm:$0xff] }
   0xb   :  { %886 = vmatpush3.bf16.msra.mxu1 %v883_v12  ;;  %v895_v33 = vpack.c.bf16 %v270_v32, %v269_v31  ;;  %v899_v36 = vpack.c.bf16 %v272_v35, %v271_v34  ;;  %v273_v37 = vld [vmem:[%s1324_s3 + $0x60] sm:$0xff]  ;;  %v274_v38 = vld [vmem:[%s1324_s3 + $0x68] sm:$0xff]  ;;  %v275_v40 = vld [vmem:[%s1324_s3 + $0x70] sm:$0xff] }
   0xc   :  { %743 = vmatmul.mubr.msk.f32.gmra.mrb[2].mxu0 %vm51_vm0, %v29_v11  ;;  %888 = vmatprep.subr.bf16.mxu1 %v887_v16  ;;  %v903_v39 = vpack.c.bf16 %v274_v38, %v273_v37  ;;  %v276_v41 = vld [vmem:[%s1324_s3 + $0x78] sm:$0xff]  ;;  %v445_v43 = vld [vmem:[%s1325_s5] sm:$0xff]  ;;  %v446_v44 = vld [vmem:[%s1325_s5 + $0x8] sm:$0xff] }
   0xd   :  { %745 = vmatprep.mubr.msk.f32.mxu0 %vm51_vm0, %v30_v15  ;;  %v907_v42 = vpack.c.bf16 %v276_v41, %v275_v40  ;;  %v447_v45 = vld [vmem:[%s1325_s5 + $0x10] sm:$0xff]  ;;  %v911_v46 = vpack.c.bf16 %v446_v44, %v445_v43  ;;  %v448_v47 = vld [vmem:[%s1325_s5 + $0x18] sm:$0xff]  ;;  %v449_v49 = vld [vmem:[%s1325_s5 + $0x20] sm:$0xff] }
   0xe   :  { %v915_v48 = vpack.c.bf16 %v448_v47, %v447_v45  ;;  %v450_v50 = vld [vmem:[%s1325_s5 + $0x28] sm:$0xff]  ;;  %v451_v52 = vld [vmem:[%s1325_s5 + $0x30] sm:$0xff]  ;;  %v452_v53 = vld [vmem:[%s1325_s5 + $0x38] sm:$0xff] }
   0xf   :  { %890 = vmatpush3.bf16.msra.mxu1 %v887_v16  ;;  %912 = vmatprep.subr.bf16.mxu0 %v911_v46  ;;  %v919_v51 = vpack.c.bf16 %v450_v50, %v449_v49  ;;  %v923_v54 = vpack.c.bf16 %v452_v53, %v451_v52  ;;  %v453_v55 = vld [vmem:[%s1325_s5 + $0x40] sm:$0xff]  ;;  %v454_v56 = vld [vmem:[%s1325_s5 + $0x48] sm:$0xff]  ;;  %v455_v43 = vld [vmem:[%s1325_s5 + $0x50] sm:$0xff] }
  0x10   :  { %746 = vmatmul.mubr.msk.f32.gmra.mrb[4].mxu0 %vm51_vm0, %v31_v17  ;;  %892 = vmatprep.subr.bf16.mxu1 %v891_v21  ;;  %v927_v57 = vpack.c.bf16 %v454_v56, %v453_v55  ;;  %v1198_v58 = vld [vmem:[%s1326_s2] ss:$0 sm:$0xff]  ;;  %v456_v44 = vld [vmem:[%s1325_s5 + $0x58] sm:$0xff]  ;;  %v458_v47 = vld [vmem:[%s1325_s5 + $0x68] sm:$0xff] }
  0x11   :  { %748 = vmatprep.mubr.msk.f32.mxu0 %vm51_vm0, %v32_v20  ;;  %914 = vmatpush3.bf16.msra.mxu0 %v911_v46  ;;  %v931_v45 = vpack.c.bf16 %v456_v44, %v455_v43  ;;  %v457_v46 = vld [vmem:[%s1325_s5 + $0x60] sm:$0xff]  ;;  %v459_v49 = vld [vmem:[%s1325_s5 + $0x70] sm:$0xff]  ;;  %v460_v50 = vld [vmem:[%s1325_s5 + $0x78] sm:$0xff] }
  0x12   :  { %916 = vmatprep.subr.bf16.mxu0 %v915_v48  ;;  %v1237_v52 = vld [vmem:[%s1327_s4] ss:$0 sm:$0xff] }
  0x13   :  { %894 = vmatpush3.bf16.msra.mxu1 %v891_v21 }
  0x14   :  { %749 = vmatmul.mubr.msk.f32.gmra.mrb[6].mxu0 %vm51_vm0, %v33_v22  ;;  %896 = vmatprep.subr.bf16.mxu1 %v895_v33 }
  0x15   :  { %751 = vmatprep.mubr.msk.f32.mxu0 %vm51_vm0, %v34_v23  ;;  %918 = vmatpush3.bf16.msra.mxu0 %v915_v48  ;;  %v935_v48 = vpack.c.bf16 %v458_v47, %v457_v46 }
  0x16   :  { %920 = vmatprep.subr.bf16.mxu0 %v919_v51 }
  0x17   :  { %898 = vmatpush3.bf16.msra.mxu1 %v895_v33 }
  0x18   :  { %752 = vmatmul.mubr.msk.f32.gmra.mrb[8].mxu0 %vm51_vm0, %v35_v24  ;;  %900 = vmatprep.subr.bf16.mxu1 %v899_v36 }
  0x19   :  { %754 = vmatprep.mubr.msk.f32.mxu0 %vm51_vm0, %v36_v25  ;;  %922 = vmatpush3.bf16.msra.mxu0 %v919_v51  ;;  %v939_v51 = vpack.c.bf16 %v460_v50, %v459_v49 }
  0x1a   :  { %924 = vmatprep.subr.bf16.mxu0 %v923_v54 }
  0x1b   :  { %902 = vmatpush3.bf16.msra.mxu1 %v899_v36 }
  0x1c   :  { %755 = vmatmul.mubr.msk.f32.gmra.mrb[10].mxu0 %vm51_vm0, %v37_v26  ;;  %904 = vmatprep.subr.bf16.mxu1 %v903_v39 }
  0x1d   :  { %757 = vmatprep.mubr.msk.f32.mxu0 %vm51_vm0, %v38_v27  ;;  %926 = vmatpush3.bf16.msra.mxu0 %v923_v54 }
  0x1e   :  { %928 = vmatprep.subr.bf16.mxu0 %v927_v57 }
  0x1f   :  { %906 = vmatpush3.bf16.msra.mxu1 %v903_v39 }
  0x20   :  { %758 = vmatmul.mubr.msk.f32.gmra.mrb[12].mxu0 %vm51_vm0, %v39_v28  ;;  %908 = vmatprep.subr.bf16.mxu1 %v907_v42 }
  0x21   :  { %760 = vmatprep.mubr.msk.f32.mxu0 %vm51_vm0, %v40_v29  ;;  %930 = vmatpush3.bf16.msra.mxu0 %v927_v57 }
  0x22   :  { %932 = vmatprep.subr.bf16.mxu0 %v931_v45 }
  0x23   :  { %910 = vmatpush3.bf16.msra.mxu1 %v907_v42 }
  0x24   :  { %761 = vmatmul.mubr.msk.f32.gmra.mrb[14].mxu0 %vm51_vm0, %v41_v30 }
  0x25   :  { %934 = vmatpush3.bf16.msra.mxu0 %v931_v45 }
  0x26   :  { %936 = vmatprep.subr.bf16.mxu0 %v935_v48 }
  0x29   :  { %938 = vmatpush3.bf16.msra.mxu0 %v935_v48 }
  0x2a   :  { %940 = vmatprep.subr.bf16.mxu0 %v939_v51 }
  0x2d   :  { %942 = vmatpush3.bf16.msra.mxu0 %v939_v51 }
  0xdb   :  { %v741_v59 = vpop.f32.mrb[0].mxu0 }
  0xdc   :  { %v172_v60 = vadd.f32 %v741_v59, %v1198_v58  ;;  %v166_v61 = vpop.f32.mrb[1].mxu0 }
  0xdd   :  { %v167_v62 = vadd.f32 %v1198_v58, %v166_v61 }
  0xdf   :  { %943 = vtanh.f32 %v167_v62  ;;  %v744_v63 = vpop.f32.mrb[2].mxu0 }
  0xe0   :  { %945 = vtanh.f32 %v172_v60  ;;  %v182_v0 = vadd.f32 %v744_v63, %v1198_v58  ;;  %v176_v1 = vpop.f32.mrb[3].mxu0 }
  0xe1   :  { %v177_v2 = vadd.f32 %v1198_v58, %v176_v1 }
  0xe3   :  { %947 = vtanh.f32 %v177_v2  ;;  %v747_v3 = vpop.f32.mrb[4].mxu0 }
  0xe4   :  { %949 = vtanh.f32 %v182_v0  ;;  %v192_v4 = vadd.f32 %v747_v3, %v1198_v58  ;;  %v186_v5 = vpop.f32.mrb[5].mxu0 }
  0xe5   :  { %v187_v6 = vadd.f32 %v1198_v58, %v186_v5 }
  0xe7   :  { %951 = vtanh.f32 %v187_v6  ;;  %v750_v7 = vpop.f32.mrb[6].mxu0 }
  0xe8   :  { %953 = vtanh.f32 %v192_v4  ;;  %v202_v8 = vadd.f32 %v750_v7, %v1198_v58  ;;  %v196_v9 = vpop.f32.mrb[7].mxu0 }
  0xe9   :  { %v944_v10 = vpop.eup %943  ;;  %v197_v11 = vadd.f32 %v1198_v58, %v196_v9 }
  0xea   :  { %v946_v12 = vpop.eup %945  ;;  %795 = vmatprep.mubr.f32.mxu1 %v944_v10 }
  0xeb   :  { %955 = vtanh.f32 %v197_v11  ;;  %v753_v13 = vpop.f32.mrb[8].mxu0  ;;  %796 = vmatmul.mubr.f32.vlgmr.msra.gmra.mrb[0].mxu1 %v946_v12 }
  0xec   :  { %957 = vtanh.f32 %v202_v8  ;;  %v212_v14 = vadd.f32 %v753_v13, %v1198_v58  ;;  %v206_v15 = vpop.f32.mrb[9].mxu0 }
  0xed   :  { %v948_v16 = vpop.eup %947  ;;  %v207_v17 = vadd.f32 %v1198_v58, %v206_v15 }
  0xee   :  { %v950_v18 = vpop.eup %949  ;;  %798 = vmatprep.mubr.f32.mxu1 %v948_v16 }
  0xef   :  { %959 = vtanh.f32 %v207_v17  ;;  %v756_v19 = vpop.f32.mrb[10].mxu0  ;;  %799 = vmatmul.mubr.f32.gmra.mrb[2].mxu1 %v950_v18 }
  0xf0   :  { %961 = vtanh.f32 %v212_v14  ;;  %v222_v20 = vadd.f32 %v756_v19, %v1198_v58  ;;  %v216_v21 = vpop.f32.mrb[11].mxu0 }
  0xf1   :  { %v952_v22 = vpop.eup %951  ;;  %v217_v23 = vadd.f32 %v1198_v58, %v216_v21 }
  0xf2   :  { %v954_v24 = vpop.eup %953  ;;  %801 = vmatprep.mubr.f32.mxu1 %v952_v22 }
  0xf3   :  { %963 = vtanh.f32 %v217_v23  ;;  %v759_v25 = vpop.f32.mrb[12].mxu0  ;;  %802 = vmatmul.mubr.f32.gmra.mrb[4].mxu1 %v954_v24 }
  0xf4   :  { %965 = vtanh.f32 %v222_v20  ;;  %v232_v26 = vadd.f32 %v759_v25, %v1198_v58  ;;  %v226_v27 = vpop.f32.mrb[13].mxu0 }
  0xf5   :  { %v956_v28 = vpop.eup %955  ;;  %v227_v29 = vadd.f32 %v1198_v58, %v226_v27 }
  0xf6   :  { %v958_v30 = vpop.eup %957  ;;  %804 = vmatprep.mubr.f32.mxu1 %v956_v28 }
  0xf7   :  { %967 = vtanh.f32 %v227_v29  ;;  %v762_v31 = vpop.f32.mrb[14].mxu0  ;;  %805 = vmatmul.mubr.f32.gmra.mrb[6].mxu1 %v958_v30 }
  0xf8   :  { %969 = vtanh.f32 %v232_v26  ;;  %v242_v32 = vadd.f32 %v762_v31, %v1198_v58  ;;  %v236_v33 = vpop.f32.mrb[15].mxu0 }
  0xf9   :  { %v960_v34 = vpop.eup %959  ;;  %v237_v35 = vadd.f32 %v1198_v58, %v236_v33 }
  0xfa   :  { %v962_v36 = vpop.eup %961  ;;  %807 = vmatprep.mubr.f32.mxu1 %v960_v34 }
  0xfb   :  { %971 = vtanh.f32 %v237_v35  ;;  %808 = vmatmul.mubr.f32.gmra.mrb[8].mxu1 %v962_v36 }
  0xfc   :  { %973 = vtanh.f32 %v242_v32 }
  0xfd   :  { %v964_v37 = vpop.eup %963 }
  0xfe   :  { %v966_v38 = vpop.eup %965  ;;  %810 = vmatprep.mubr.f32.mxu1 %v964_v37  ;;  %v652_v37 = vld [vmem:[%s1328_s6] ss:$0 sm:$0xff] }
  0xff   :  { %811 = vmatmul.mubr.f32.gmra.mrb[10].mxu1 %v966_v38 }
 0x101   :  { %v968_v39 = vpop.eup %967 }
 0x102   :  { %v970_v40 = vpop.eup %969  ;;  %813 = vmatprep.mubr.f32.mxu1 %v968_v39 }
 0x103   :  { %814 = vmatmul.mubr.f32.gmra.mrb[12].mxu1 %v970_v40 }
 0x105   :  { %v972_v41 = vpop.eup %971 }
 0x106   :  { %v974_v42 = vpop.eup %973  ;;  %816 = vmatprep.mubr.f32.mxu1 %v972_v41 }
 0x107   :  { %817 = vmatmul.mubr.f32.gmra.mrb[14].mxu1 %v974_v42 }
 0x1be   :  { %v797_v53 = vpop.f32.mrb[0].mxu1 }
 0x1bf   :  { %v356_v54 = vadd.f32 %v797_v53, %v1237_v52  ;;  %v350_v55 = vpop.f32.mrb[1].mxu1 }
 0x1c0   :  { %v351_v56 = vadd.f32 %v1237_v52, %v350_v55 }
 0x1c2   :  { %975 = vtanh.f32 %v351_v56  ;;  %v800_v57 = vpop.f32.mrb[2].mxu1 }
 0x1c3   :  { %977 = vtanh.f32 %v356_v54  ;;  %v366_v58 = vadd.f32 %v800_v57, %v1237_v52  ;;  %v360_v59 = vpop.f32.mrb[3].mxu1 }
 0x1c4   :  { %v361_v60 = vadd.f32 %v1237_v52, %v360_v59 }
 0x1c6   :  { %979 = vtanh.f32 %v361_v60  ;;  %v803_v61 = vpop.f32.mrb[4].mxu1 }
 0x1c7   :  { %981 = vtanh.f32 %v366_v58  ;;  %v376_v62 = vadd.f32 %v803_v61, %v1237_v52  ;;  %v370_v63 = vpop.f32.mrb[5].mxu1 }
 0x1c8   :  { %v371_v0 = vadd.f32 %v1237_v52, %v370_v63 }
 0x1ca   :  { %983 = vtanh.f32 %v371_v0  ;;  %v806_v1 = vpop.f32.mrb[6].mxu1 }
 0x1cb   :  { %985 = vtanh.f32 %v376_v62  ;;  %v386_v2 = vadd.f32 %v806_v1, %v1237_v52  ;;  %v380_v3 = vpop.f32.mrb[7].mxu1 }
 0x1cc   :  { %v976_v4 = vpop.eup %975  ;;  %v381_v5 = vadd.f32 %v1237_v52, %v380_v3 }
 0x1cd   :  { %v978_v6 = vpop.eup %977  ;;  %851 = vmatprep.mubr.f32.mxu0 %v976_v4 }
 0x1ce   :  { %987 = vtanh.f32 %v381_v5  ;;  %v809_v7 = vpop.f32.mrb[8].mxu1  ;;  %852 = vmatmul.mubr.f32.vlgmr.msra.gmra.mrb[16].mxu0 %v978_v6 }
 0x1cf   :  { %989 = vtanh.f32 %v386_v2  ;;  %v396_v8 = vadd.f32 %v809_v7, %v1237_v52  ;;  %v390_v9 = vpop.f32.mrb[9].mxu1 }
 0x1d0   :  { %v980_v10 = vpop.eup %979  ;;  %v391_v11 = vadd.f32 %v1237_v52, %v390_v9 }
 0x1d1   :  { %v982_v12 = vpop.eup %981  ;;  %854 = vmatprep.mubr.f32.mxu0 %v980_v10 }
 0x1d2   :  { %991 = vtanh.f32 %v391_v11  ;;  %v812_v13 = vpop.f32.mrb[10].mxu1  ;;  %855 = vmatmul.mubr.f32.gmra.mrb[18].mxu0 %v982_v12 }
 0x1d3   :  { %993 = vtanh.f32 %v396_v8  ;;  %v406_v14 = vadd.f32 %v812_v13, %v1237_v52  ;;  %v400_v15 = vpop.f32.mrb[11].mxu1 }
 0x1d4   :  { %v984_v16 = vpop.eup %983  ;;  %v401_v17 = vadd.f32 %v1237_v52, %v400_v15 }
 0x1d5   :  { %v986_v18 = vpop.eup %985  ;;  %857 = vmatprep.mubr.f32.mxu0 %v984_v16 }
 0x1d6   :  { %995 = vtanh.f32 %v401_v17  ;;  %v815_v19 = vpop.f32.mrb[12].mxu1  ;;  %858 = vmatmul.mubr.f32.gmra.mrb[20].mxu0 %v986_v18 }
 0x1d7   :  { %997 = vtanh.f32 %v406_v14  ;;  %v416_v20 = vadd.f32 %v815_v19, %v1237_v52  ;;  %v410_v21 = vpop.f32.mrb[13].mxu1 }
 0x1d8   :  { %v988_v22 = vpop.eup %987  ;;  %v411_v23 = vadd.f32 %v1237_v52, %v410_v21 }
 0x1d9   :  { %v990_v24 = vpop.eup %989  ;;  %860 = vmatprep.mubr.f32.mxu0 %v988_v22 }
 0x1da   :  { %999 = vtanh.f32 %v411_v23  ;;  %v818_v25 = vpop.f32.mrb[14].mxu1  ;;  %861 = vmatmul.mubr.f32.gmra.mrb[22].mxu0 %v990_v24 }
 0x1db   :  { %1001 = vtanh.f32 %v416_v20  ;;  %v426_v26 = vadd.f32 %v818_v25, %v1237_v52  ;;  %v420_v27 = vpop.f32.mrb[15].mxu1 }
 0x1dc   :  { %v992_v28 = vpop.eup %991  ;;  %v421_v29 = vadd.f32 %v1237_v52, %v420_v27 }
 0x1dd   :  { %v994_v30 = vpop.eup %993  ;;  %863 = vmatprep.mubr.f32.mxu0 %v992_v28 }
 0x1de   :  { %1003 = vtanh.f32 %v421_v29  ;;  %864 = vmatmul.mubr.f32.gmra.mrb[24].mxu0 %v994_v30 }
 0x1df   :  { %1005 = vtanh.f32 %v426_v26 }
 0x1e0   :  { %v996_v31 = vpop.eup %995 }
 0x1e1   :  { %v998_v32 = vpop.eup %997  ;;  %866 = vmatprep.mubr.f32.mxu0 %v996_v31 }
 0x1e2   :  { %867 = vmatmul.mubr.f32.gmra.mrb[26].mxu0 %v998_v32 }
 0x1e4   :  { %v1000_v33 = vpop.eup %999 }
 0x1e5   :  { %v1002_v34 = vpop.eup %1001  ;;  %869 = vmatprep.mubr.f32.mxu0 %v1000_v33 }
 0x1e6   :  { %870 = vmatmul.mubr.f32.gmra.mrb[28].mxu0 %v1002_v34 }
 0x1e8   :  { %v1004_v35 = vpop.eup %1003 }
 0x1e9   :  { %v1006_v36 = vpop.eup %1005  ;;  %872 = vmatprep.mubr.f32.mxu0 %v1004_v35 }
 0x1ea   :  { %873 = vmatmul.mubr.f32.gmra.mrb[30].mxu0 %v1006_v36 }
 0x2a1   :  { %v853_v38 = vpop.f32.mrb[16].mxu0 }
 0x2a2   :  { %v540_v39 = vadd.f32 %v853_v38, %v652_v37  ;;  %v534_v40 = vpop.f32.mrb[17].mxu0 }
 0x2a3   :  { %v535_v41 = vadd.f32 %v652_v37, %v534_v40 }
 0x2a4   :  { %615 = vst.msk [vmem:[%s1329_s7 + $0x8] sm:$0xff] %vm613_vm1, %v540_v39 }
 0x2a5   :  { %614 = vst.msk [vmem:[%s1329_s7] sm:$0xff] %vm613_vm1, %v535_v41  ;;  %v856_v42 = vpop.f32.mrb[18].mxu0 }
 0x2a6   :  { %v550_v43 = vadd.f32 %v856_v42, %v652_v37  ;;  %v544_v44 = vpop.f32.mrb[19].mxu0 }
 0x2a7   :  { %v545_v45 = vadd.f32 %v652_v37, %v544_v44 }
 0x2a8   :  { %617 = vst.msk [vmem:[%s1329_s7 + $0x18] sm:$0xff] %vm613_vm1, %v550_v43 }
 0x2a9   :  { %616 = vst.msk [vmem:[%s1329_s7 + $0x10] sm:$0xff] %vm613_vm1, %v545_v45  ;;  %v859_v46 = vpop.f32.mrb[20].mxu0 }
 0x2aa   :  { %v560_v47 = vadd.f32 %v859_v46, %v652_v37  ;;  %v554_v48 = vpop.f32.mrb[21].mxu0 }
 0x2ab   :  { %v555_v49 = vadd.f32 %v652_v37, %v554_v48 }
 0x2ac   :  { %619 = vst.msk [vmem:[%s1329_s7 + $0x28] sm:$0xff] %vm613_vm1, %v560_v47 }
 0x2ad   :  { %618 = vst.msk [vmem:[%s1329_s7 + $0x20] sm:$0xff] %vm613_vm1, %v555_v49  ;;  %v862_v50 = vpop.f32.mrb[22].mxu0 }
 0x2ae   :  { %v570_v51 = vadd.f32 %v862_v50, %v652_v37  ;;  %v564_v52 = vpop.f32.mrb[23].mxu0 }
 0x2af   :  { %v565_v53 = vadd.f32 %v652_v37, %v564_v52 }
 0x2b0   :  { %621 = vst.msk [vmem:[%s1329_s7 + $0x38] sm:$0xff] %vm613_vm1, %v570_v51 }
 0x2b1   :  { %620 = vst.msk [vmem:[%s1329_s7 + $0x30] sm:$0xff] %vm613_vm1, %v565_v53  ;;  %v865_v54 = vpop.f32.mrb[24].mxu0 }
 0x2b2   :  { %v580_v55 = vadd.f32 %v865_v54, %v652_v37  ;;  %v574_v56 = vpop.f32.mrb[25].mxu0 }
 0x2b3   :  { %v575_v57 = vadd.f32 %v652_v37, %v574_v56 }
 0x2b4   :  { %623 = vst.msk [vmem:[%s1329_s7 + $0x48] sm:$0xff] %vm613_vm1, %v580_v55 }
 0x2b5   :  { %622 = vst.msk [vmem:[%s1329_s7 + $0x40] sm:$0xff] %vm613_vm1, %v575_v57  ;;  %v868_v58 = vpop.f32.mrb[26].mxu0 }
 0x2b6   :  { %v590_v59 = vadd.f32 %v868_v58, %v652_v37  ;;  %v584_v60 = vpop.f32.mrb[27].mxu0 }
 0x2b7   :  { %v585_v61 = vadd.f32 %v652_v37, %v584_v60 }
 0x2b8   :  { %625 = vst.msk [vmem:[%s1329_s7 + $0x58] sm:$0xff] %vm613_vm1, %v590_v59 }
 0x2b9   :  { %624 = vst.msk [vmem:[%s1329_s7 + $0x50] sm:$0xff] %vm613_vm1, %v585_v61  ;;  %v871_v62 = vpop.f32.mrb[28].mxu0 }
 0x2ba   :  { %v600_v63 = vadd.f32 %v871_v62, %v652_v37  ;;  %v594_v0 = vpop.f32.mrb[29].mxu0 }
 0x2bb   :  { %v595_v1 = vadd.f32 %v652_v37, %v594_v0 }
 0x2bc   :  { %627 = vst.msk [vmem:[%s1329_s7 + $0x68] sm:$0xff] %vm613_vm1, %v600_v63 }
 0x2bd   :  { %626 = vst.msk [vmem:[%s1329_s7 + $0x60] sm:$0xff] %vm613_vm1, %v595_v1  ;;  %v874_v2 = vpop.f32.mrb[30].mxu0 }
 0x2be   :  { %v610_v3 = vadd.f32 %v874_v2, %v652_v37  ;;  %v604_v4 = vpop.f32.mrb[31].mxu0 }
 0x2bf   :  { %v605_v5 = vadd.f32 %v652_v37, %v604_v4 }
 0x2c0   :  { %629 = vst.msk [vmem:[%s1329_s7 + $0x78] sm:$0xff] %vm613_vm1, %v610_v3 }
 0x2c1   :  { %628 = vst.msk [vmem:[%s1329_s7 + $0x70] sm:$0xff] %vm613_vm1, %v605_v5 }

</bundles_post_ra>
